<compile_context>
chip_gen: v7x
topology: tpu7x:2x2x1
jax: 0.10.0
libtpu: 0.0.40
codegen_flags: <defaults>
</compile_context>

<pallas_src>
import functools

import jax
import jax.numpy as jnp
from jax.experimental import pallas as pl
from jax.experimental.pallas import tpu as pltpu

BN_EPS = 1e-5
NUM_CORES = 2                          # v7x TensorCores; extra axis is harmless on v5e/v6e
VMEM_LIMIT_BYTES = 40 * 1024 * 1024    # < v7x's 64 MiB physical VMEM; plenty on v5e/v6e


def _round_up(a, m):
    return (a + m - 1) // m * m


def _choose_row_tile(n, width):
    """Rows per tile: multiple of 8, <= 8192 rows and <= ~4 MiB of x per tile."""
    cap_rows = max(8, (4 * 1024 * 1024) // max(4 * width, 1))
    tile = max(8, (min(8192, cap_rows) // 8) * 8)
    return min(tile, _round_up(n, 8))


def _gram_stats_kernel(x_ref, sum_ref, gram_ref, *, n_rows, row_tile,
                       tiles_per_core, needs_mask):
    """Pass 1: per-core partial sum_x (1,1,T) and Gram matrix x^T x (1,T,T)."""
    i = pl.program_id(1)

    @pl.when(i == 0)
    def _():
        sum_ref[...] = jnp.zeros_like(sum_ref)
        gram_ref[...] = jnp.zeros_like(gram_ref)

    x = x_ref[...]
    if needs_mask:
        # Global row ids of this tile; rows >= n (ragged tail and phantom
        # tiles of the rounded-up per-core grid) contribute exactly zero.
        tile_idx = pl.program_id(0) * tiles_per_core + i
        rows = tile_idx * row_tile + jax.lax.broadcasted_iota(
            jnp.int32, (row_tile, 1), 0)
        x = jnp.where(rows < n_rows, x, 0.0)

    t = x.shape[1]
    sum_ref[...] += jnp.sum(x, axis=0).reshape(1, 1, t)
    gram_ref[...] += jax.lax.dot_general(            # x^T @ x on the MXU
        x, x, (((0,), (0,)), ((), ())),
        preferred_element_type=jnp.float32).reshape(1, t, t)


def _project_kernel(x_ref, v_ref, b_ref, o_ref):
    """Pass 2: out = sigmoid(x @ v + b_eff), stored lane-dense as (1,1,tile)."""
    z = jnp.sum(x_ref[...] * v_ref[...], axis=1, keepdims=True) + b_ref[0]
    o_ref[...] = jax.nn.sigmoid(z).reshape(o_ref.shape)


@functools.partial(jax.jit, static_argnames=("row_tile",))
def linear_model_forward(x, w1, b1, gamma, beta, w2, b2, *, row_tile=None):
    """x: (N, T) f32 -> (N, 1) f32.

    Weights use (in, out) layout: w1 (T, 64), w2 (64, 1); b1/gamma/beta
    (1, 64), b2 (1, 1).  Reproduces the PyTorch LinearModel forward in
    training mode (BatchNorm1d batch statistics, biased variance, eps=1e-5).
    b1 is accepted for signature compatibility but cancels exactly through
    the batch-mean subtraction; with running (eval-mode) statistics this
    folding would NOT be valid.
    """
    del b1                               # cancels through training-mode BatchNorm
    n, t = x.shape
    hidden = w1.shape[1]

    tile = row_tile if row_tile is not None else _choose_row_tile(n, t)
    assert tile % 8 == 0
    num_tiles = pl.cdiv(n, tile)          # no jnp.pad: tail rows masked in-kernel
    num_cores = min(NUM_CORES, num_tiles)
    tiles_per_core = pl.cdiv(num_tiles, num_cores)
    grid_tiles = num_cores * tiles_per_core   # may include phantom tiles
    needs_mask = (grid_tiles * tile != n)
    last_block = num_tiles - 1

    # ---- Pass 1: streamed x -> per-core (sum_x, Gram) partials --------------
    stats_kernel = functools.partial(
        _gram_stats_kernel, n_rows=n, row_tile=tile,
        tiles_per_core=tiles_per_core, needs_mask=needs_mask)

    def x_map_pass1(c, i):
        # Clamp so phantom tiles never issue an out-of-bounds DMA; their
        # contribution is zeroed by the row mask inside the kernel.
        return (jnp.minimum(c * tiles_per_core + i, last_block), 0)

    sum_part, gram_part = pl.pallas_call(
        stats_kernel,
        out_shape=(
            jax.ShapeDtypeStruct((num_cores, 1, t), jnp.float32),
            jax.ShapeDtypeStruct((num_cores, t, t), jnp.float32),
        ),
        grid=(num_cores, tiles_per_core),
        in_specs=[pl.BlockSpec((tile, t), x_map_pass1)],
        out_specs=(
            pl.BlockSpec((1, 1, t), lambda c, i: (c, 0, 0)),   # per-core sum_x
            pl.BlockSpec((1, t, t), lambda c, i: (c, 0, 0)),   # per-core Gram
        ),
        compiler_params=pltpu.CompilerParams(
            dimension_semantics=("parallel", "arbitrary"),
            vmem_limit_bytes=VMEM_LIMIT_BYTES),
    )(x)

    # ---- Glue: O(t*hidden) fold of BN + biases + W2 + W1 into (v, b_eff) ----
    hp = jax.lax.Precision.HIGHEST
    sum_x = jnp.sum(sum_part, axis=0)                       # (1, t)
    gram = jnp.sum(gram_part, axis=0)                       # (t, t)
    inv_n = 1.0 / n
    mean = jnp.dot(sum_x, w1, precision=hp) * inv_n         # E[x @ W1]   (1, 64)
    ex2 = jnp.sum(jnp.dot(gram, w1, precision=hp) * w1,
                  axis=0, keepdims=True) * inv_n            # diag(W1^T G W1)/n
    var = jnp.maximum(ex2 - mean * mean, 0.0)               # biased batch variance
    inv_std = jax.lax.rsqrt(var + BN_EPS)
    w2_row = w2.reshape(1, hidden)
    w_eff = gamma * inv_std * w2_row                        # (1, 64)
    v = jnp.dot(w1, w_eff.reshape(hidden, 1), precision=hp).reshape(1, t)
    b_eff = (b2.reshape(()) + jnp.sum(beta * w2_row)
             - jnp.sum(mean * w_eff)).reshape(1)            # (1,) scalar

    # ---- Pass 2: out = sigmoid(x @ v + b_eff), lane-dense output ------------
    out_tiles = pl.pallas_call(
        _project_kernel,
        out_shape=jax.ShapeDtypeStruct((num_tiles, 1, tile), jnp.float32),
        grid=(num_tiles,),
        in_specs=[
            pl.BlockSpec((tile, t), lambda i: (i, 0)),           # x re-read (streamed)
            pl.BlockSpec((1, t), lambda i: (0, 0)),              # v (resident)
            pl.BlockSpec(memory_space=pltpu.MemorySpace.SMEM),   # b_eff scalar
        ],
        out_specs=pl.BlockSpec((1, 1, tile), lambda i: (i, 0, 0)),
        compiler_params=pltpu.CompilerParams(
            dimension_semantics=("parallel",),                   # megacore-sharded
            vmem_limit_bytes=VMEM_LIMIT_BYTES),
    )(x, v, b_eff)

    return out_tiles.reshape(num_tiles * tile)[:n].reshape(n, 1)


def init_params(key, t, hidden=64):
    """Deterministic parameter init (PyTorch-style uniform fan-in bounds)."""
    k1, k2, k3, k4 = jax.random.split(key, 4)
    bound1 = 1.0 / jnp.sqrt(t)
    w1 = jax.random.uniform(k1, (t, hidden), jnp.float32, -bound1, bound1)
    b1 = jax.random.uniform(k2, (1, hidden), jnp.float32, -bound1, bound1)
    gamma = jnp.ones((1, hidden), jnp.float32)   # BatchNorm weight init
    beta = jnp.zeros((1, hidden), jnp.float32)   # BatchNorm bias init
    bound2 = 1.0 / jnp.sqrt(hidden)
    w2 = jax.random.uniform(k3, (hidden, 1), jnp.float32, -bound2, bound2)
    b2 = jax.random.uniform(k4, (1, 1), jnp.float32, -bound2, bound2)
    return w1, b1, gamma, beta, w2, b2


def _reference(x, w1, b1, gamma, beta, w2, b2):
    """Pure-JAX reference of the PyTorch training-mode forward."""
    hp = jax.lax.Precision.HIGHEST
    h = jnp.dot(x, w1, precision=hp) + b1
    mu = h.mean(axis=0, keepdims=True)
    var = ((h - mu) ** 2).mean(axis=0, keepdims=True)
    hn = (h - mu) * jax.lax.rsqrt(var + BN_EPS) * gamma + beta
    return jax.nn.sigmoid(jnp.dot(hn, w2, precision=hp) + b2)


if __name__ == "__main__":
    key = jax.random.PRNGKey(0)
    k_x1, k_x2, k_p = jax.random.split(key, 3)

    T = 32
    params = init_params(k_p, T)

    # Case 1: tiny batch (the module's toy regime) — single tile, no masking.
    x_small = jax.random.normal(k_x1, (8, T), jnp.float32)
    # Case 2: multi-tile batch with a ragged tail — exercises in-kernel row
    # masking, the 2-TensorCore partial accumulators and the phantom-tile clamp.
    x_big = jax.random.normal(k_x2, (3300, T), jnp.float32)

    for x, row_tile in ((x_small, None), (x_big, 512)):
        out = linear_model_forward(x, *params, row_tile=row_tile)
        jax.block_until_ready(out)
        ref = _reference(x, *params)
        assert out.shape == (x.shape[0], 1)
        max_err = float(jnp.max(jnp.abs(out - ref)))
        # Small slack over 2e-5 for MXU f32 rounding vs HIGHEST-precision ref.
        assert jnp.allclose(out, ref, atol=3e-5, rtol=3e-5), max_err

    print("KERNEL_OK")
</pallas_src>

<mosaic_0001>
module attributes {stable_mosaic.version = 11 : i64} {
  func.func @_gram_stats_kernel(%arg0: i32, %arg1: i32, %arg2: memref<8x32xf32, #tpu.memory_space<vmem>>, %arg3: memref<1x1x32xf32, #tpu.memory_space<vmem>>, %arg4: memref<1x32x32xf32, #tpu.memory_space<vmem>>) attributes {dimension_semantics = [#tpu.dimension_semantics<parallel>, #tpu.dimension_semantics<arbitrary>], iteration_bounds = array<i64: 1, 1>, scalar_prefetch = 0 : i64, scratch_operands = 0 : i64, tpu.core_type = #tpu.core_type<tc>, window_params = [{transform_indices = @transform_0, window_bounds = array<i64: 8, 32>}, {transform_indices = @transform_1, window_bounds = array<i64: 1, 1, 32>}, {transform_indices = @transform_2, window_bounds = array<i64: 1, 32, 32>}]} {
    %c0_i32 = arith.constant 0 : i32
    %0 = arith.cmpi eq, %arg1, %c0_i32 : i32
    %1 = arith.extui %0 : i1 to i32
    %c0_i32_0 = arith.constant 0 : i32
    %2 = arith.cmpi ne, %1, %c0_i32_0 : i32
    scf.if %2 {
      %cst_15 = arith.constant 0.000000e+00 : f32
      %14 = vector.broadcast %cst_15 : f32 to vector<1x1x32xf32>
      %c0_16 = arith.constant 0 : index
      %c0_17 = arith.constant 0 : index
      %c0_18 = arith.constant 0 : index
      %15 = vector.load %arg3[%c0_16, %c0_17, %c0_18] : memref<1x1x32xf32, #tpu.memory_space<vmem>>, vector<1x1x32xf32>
      tpu.vector_store %arg3[%c0_16, %c0_17, %c0_18], %14 {strides = array<i32>} : memref<1x1x32xf32, #tpu.memory_space<vmem>>, vector<1x1x32xf32>,
      %cst_19 = arith.constant 0.000000e+00 : f32
      %16 = vector.broadcast %cst_19 : f32 to vector<1x32x32xf32>
      %c0_20 = arith.constant 0 : index
      %c0_21 = arith.constant 0 : index
      %c0_22 = arith.constant 0 : index
      %17 = vector.load %arg4[%c0_20, %c0_21, %c0_22] : memref<1x32x32xf32, #tpu.memory_space<vmem>>, vector<1x32x32xf32>
      tpu.vector_store %arg4[%c0_20, %c0_21, %c0_22], %16 {strides = array<i32>} : memref<1x32x32xf32, #tpu.memory_space<vmem>>, vector<1x32x32xf32>,
    } else {
    }
    %c0 = arith.constant 0 : index
    %c0_1 = arith.constant 0 : index
    %3 = vector.load %arg2[%c0, %c0_1] : memref<8x32xf32, #tpu.memory_space<vmem>>, vector<8x32xf32>
    %c0_2 = arith.constant 0 : index
    %c0_3 = arith.constant 0 : index
    %c0_4 = arith.constant 0 : index
    %4 = vector.load %arg3[%c0_2, %c0_3, %c0_4] : memref<1x1x32xf32, #tpu.memory_space<vmem>>, vector<1x1x32xf32>
    %cst = arith.constant dense<0.000000e+00> : vector<32xf32>
    %5 = vector.multi_reduction <add>, %3, %cst [0] : vector<8x32xf32> to vector<32xf32>
    %6 = vector.shape_cast %5 : vector<32xf32> to vector<1x1x32xf32>
    %7 = arith.addf %4, %6 : vector<1x1x32xf32>
    %c0_5 = arith.constant 0 : index
    %c0_6 = arith.constant 0 : index
    %c0_7 = arith.constant 0 : index
    %8 = vector.load %arg3[%c0_5, %c0_6, %c0_7] : memref<1x1x32xf32, #tpu.memory_space<vmem>>, vector<1x1x32xf32>
    tpu.vector_store %arg3[%c0_5, %c0_6, %c0_7], %7 {strides = array<i32>} : memref<1x1x32xf32, #tpu.memory_space<vmem>>, vector<1x1x32xf32>,
    %c0_8 = arith.constant 0 : index
    %c0_9 = arith.constant 0 : index
    %c0_10 = arith.constant 0 : index
    %9 = vector.load %arg4[%c0_8, %c0_9, %c0_10] : memref<1x32x32xf32, #tpu.memory_space<vmem>>, vector<1x32x32xf32>
    %cst_11 = arith.constant dense<0.000000e+00> : vector<32x32xf32>
    %10 = tpu.matmul %3, %3, %cst_11 {dimension_numbers = #tpu.dot_dimension_numbers<[0], [0], [1], [1], [0, 1, 1, 1], [], []>} : vector<8x32xf32>, vector<8x32xf32>, vector<32x32xf32> -> vector<32x32xf32>
    %11 = vector.shape_cast %10 : vector<32x32xf32> to vector<1x32x32xf32>
    %12 = arith.addf %9, %11 : vector<1x32x32xf32>
    %c0_12 = arith.constant 0 : index
    %c0_13 = arith.constant 0 : index
    %c0_14 = arith.constant 0 : index
    %13 = vector.load %arg4[%c0_12, %c0_13, %c0_14] : memref<1x32x32xf32, #tpu.memory_space<vmem>>, vector<1x32x32xf32>
    tpu.vector_store %arg4[%c0_12, %c0_13, %c0_14], %12 {strides = array<i32>} : memref<1x32x32xf32, #tpu.memory_space<vmem>>, vector<1x32x32xf32>,
    return
  }
  func.func @transform_0(%arg0: i32, %arg1: i32) -> (i32, i32) {
    %c1_i32 = arith.constant 1 : i32
    %0 = arith.muli %arg0, %c1_i32 : i32
    %1 = arith.addi %0, %arg1 : i32
    %c0_i32 = arith.constant 0 : i32
    %2 = arith.minsi %1, %c0_i32 : i32
    %c0_i32_0 = arith.constant 0 : i32
    %c0_i32_1 = arith.constant 0 : i32
    return %2, %c0_i32_0 : i32, i32
  }
  func.func @transform_1(%arg0: i32, %arg1: i32) -> (i32, i32, i32) {
    %c0_i32 = arith.constant 0 : i32
    %c0_i32_0 = arith.constant 0 : i32
    %c0_i32_1 = arith.constant 0 : i32
    return %arg0, %c0_i32, %c0_i32_0 : i32, i32, i32
  }
  func.func @transform_2(%arg0: i32, %arg1: i32) -> (i32, i32, i32) {
    %c0_i32 = arith.constant 0 : i32
    %c0_i32_0 = arith.constant 0 : i32
    %c0_i32_1 = arith.constant 0 : i32
    return %arg0, %c0_i32, %c0_i32_0 : i32, i32, i32
  }
}

module attributes {stable_mosaic.version = 11 : i64} {
  func.func @_project_kernel(%arg0: i32, %arg1: memref<8x32xf32, #tpu.memory_space<vmem>>, %arg2: memref<1x32xf32, #tpu.memory_space<vmem>>, %arg3: memref<1xf32, #tpu.memory_space<smem>>, %arg4: memref<1x1x8xf32, #tpu.memory_space<vmem>>) attributes {dimension_semantics = [#tpu.dimension_semantics<parallel>], iteration_bounds = array<i64: 1>, scalar_prefetch = 0 : i64, scratch_operands = 0 : i64, tpu.core_type = #tpu.core_type<tc>, window_params = [{transform_indices = @transform_0, window_bounds = array<i64: 8, 32>}, {pipeline_mode = #tpu.pipeline_mode<synchronous>, transform_indices = @transform_1, window_bounds = array<i64: 1, 32>}, {transform_indices = @transform_2, window_bounds = array<i64: 1>}, {transform_indices = @transform_3, window_bounds = array<i64: 1, 1, 8>}]} {
    %c0 = arith.constant 0 : index
    %c0_0 = arith.constant 0 : index
    %0 = vector.load %arg1[%c0, %c0_0] : memref<8x32xf32, #tpu.memory_space<vmem>>, vector<8x32xf32>
    %c0_1 = arith.constant 0 : index
    %c0_2 = arith.constant 0 : index
    %1 = vector.load %arg2[%c0_1, %c0_2] : memref<1x32xf32, #tpu.memory_space<vmem>>, vector<1x32xf32>
    %2 = vector.broadcast %1 : vector<1x32xf32> to vector<8x32xf32>
    %3 = arith.mulf %0, %2 : vector<8x32xf32>
    %cst = arith.constant dense<0.000000e+00> : vector<8xf32>
    %4 = vector.multi_reduction <add>, %3, %cst [1] : vector<8x32xf32> to vector<8xf32>
    %5 = vector.shape_cast %4 : vector<8xf32> to vector<8x1xf32>
    %c0_3 = arith.constant 0 : index
    %6 = memref.load %arg3[%c0_3] : memref<1xf32, #tpu.memory_space<smem>>
    %7 = vector.broadcast %6 : f32 to vector<8x1xf32>
    %8 = arith.addf %5, %7 : vector<8x1xf32>
    %9 = arith.negf %8 : vector<8x1xf32>
    %10 = math.exp %9 : vector<8x1xf32>
    %cst_4 = arith.constant 1.000000e+00 : f32
    %11 = vector.broadcast %cst_4 : f32 to vector<8x1xf32>
    %12 = arith.addf %11, %10 : vector<8x1xf32>
    %13 = arith.divf %11, %12 : vector<8x1xf32>
    %14 = vector.shape_cast %13 : vector<8x1xf32> to vector<1x1x8xf32>
    %c0_5 = arith.constant 0 : index
    %c0_6 = arith.constant 0 : index
    %c0_7 = arith.constant 0 : index
    %15 = vector.load %arg4[%c0_5, %c0_6, %c0_7] : memref<1x1x8xf32, #tpu.memory_space<vmem>>, vector<1x1x8xf32>
    tpu.vector_store %arg4[%c0_5, %c0_6, %c0_7], %14 {strides = array<i32>} : memref<1x1x8xf32, #tpu.memory_space<vmem>>, vector<1x1x8xf32>,
    return
  }
  func.func @transform_0(%arg0: i32) -> (i32, i32) {
    %c0_i32 = arith.constant 0 : i32
    %c0_i32_0 = arith.constant 0 : i32
    return %arg0, %c0_i32 : i32, i32
  }
  func.func @transform_1(%arg0: i32) -> (i32, i32) {
    %c0_i32 = arith.constant 0 : i32
    %c0_i32_0 = arith.constant 0 : i32
    %c0_i32_1 = arith.constant 0 : i32
    return %c0_i32, %c0_i32_0 : i32, i32
  }
  func.func @transform_2(%arg0: i32) -> i32 {
    %c0_i32 = arith.constant 0 : i32
    %c0_i32_0 = arith.constant 0 : i32
    return %c0_i32 : i32
  }
  func.func @transform_3(%arg0: i32) -> (i32, i32, i32) {
    %c0_i32 = arith.constant 0 : i32
    %c0_i32_0 = arith.constant 0 : i32
    %c0_i32_1 = arith.constant 0 : i32
    return %arg0, %c0_i32, %c0_i32_0 : i32, i32, i32
  }
}

</mosaic_0001>

<bundles_post_ra>
// kernel: linear_model_forward.3
= control target key start
LH: loop header
LB: loop body
LE: loop exit
PB: predicated region body
PF: predicated region fallthrough
CT: control target
= control target key end

     0   :  { %vm25_vm0 = vcmask 261120   ;;  %s135_s0 = inlined_call_operand.vmem [shape: f32[8,32], index: 0, kind: input, shape index: {}]   ;;  %s136_s1 = inlined_call_operand.vmem [shape: f32[1,32], index: 1, kind: input, shape index: {}]   ;;  %s137_s2 = inlined_call_operand.<no memory space> [shape: f32[1], index: 2, kind: input, shape index: {}]   ;;  %s138_s3 = inlined_call_operand.hbm [shape: f32[1,1,8], index: 3, kind: output, shape index: {}]  }
   0x1   :  { %v16_v0 = vld [vmem:[%s135_s0] sm:$0xff] }
   0x2   :  { %v62_v1 = vld [vmem:[%s136_s1] ss:$0 sm:$0xff] }
   0x3   :  { %9 = vsyncpa [#allocation4], 0  ;;  %v24_v2 = vmul.f32 %v62_v1, %v16_v0  ;;  %v30_v4 = vstv %s137_s2  ;;  %v39_v10 = vlaneseq  ;;  %s93_s0 = smov [#allocation3]   ;;  %vm46_vm1 = vcmask 57344  }
   0x4   :  { %s54_s1 = sshll.u32 %s93_s0, 4  ;;  %s55_s1 = int_to_ptr.vmem [resolvable:$true] %s54_s1 }
   0x5   :  { %v26_v3 = vsel %vm25_vm0, %v24_v2, 0.0  ;;  %v40_v11 = vand.u32 127, %v39_v10  ;;  %v42_v12 = vshrl.u32 %v39_v10, 7  ;;  %s69_s18 = scalar_lea.vmem %s55_s1, 16  ;;  %s73_s2 = scalar_lea.vmem %s55_s1, 32 }
   0x6   :  { %27 = vadd.xlane.f32.xlu0 %v26_v3  ;;  %p70_p0 = scmp.ne.s32.totalorder %s55_s1, %s69_s18  ;;  %p74_p1 = scmp.lt.s32.totalorder %s55_s1, %s55_s1 }
   0x7   :  { %v43_v13 = vsub.s32 %v40_v11, %v42_v12  ;;  %p75_p2 = scmp.lt.s32.totalorder %s73_s2, %s69_s18 }
   0x9   :  { %p76_p3 = por %p75_p2, %p74_p1 }
   0xb   :  { %p77_p4 = pnand %p76_p3, %p70_p0 }
  0x93   :  { %v28_v5 = vpop.xlane.xlu0 %27 }
  0x94   :  { %v31_v6 = vadd.f32 %v30_v4, %v28_v5 }
  0x96   :  { %v63_v7 = vmul.f32 -1.442695, %v31_v6 }
  0x98   :  { %65 = vpow2.f32 %v63_v7 }
  0xa2   :  { %v66_v8 = vpop.eup %65 }
  0xa3   :  { %v35_v9 = vadd.f32 1.0, %v66_v8 }
  0xa5   :  { %67 = vrcp.f32 %v35_v9 }
  0xaf   :  { %v68_v14 = vpop.eup %67 }
  0xb0   :  { %v44_v15 = vrot.slane %v68_v14, %v43_v13 }
  0xb2   :  { %47 = vst.msk [vmem:[#allocation3] sm:$0x1] %vm46_vm1, %v44_v15 }
  0xb3   :  { %80 = shalt.err (!%p77_p4)
}
  0xb4   :  { %s81_s21 = scalar_lea.hbm %s138_s3, 16 }
  0xb5   :  { %p82_p5 = scmp.ne.s32.totalorder %s138_s3, %s81_s21  ;;  %p85_p6 = scmp.lt.u32.totalorder %s81_s21, %s138_s3 }
  0xb7   :  { %p87_p7 = pnand %p85_p6, %p82_p5 }
  0xb9   :  { %90 = shalt.err (!%p87_p7)
}
  0xba   :  { %57 = dma.vmem_to_hbm [thread:$0]  %s55_s1, 16, %s138_s3, [#allocation4]  }
  0xbb   :  { %91 = dma.done.wait [#allocation4], 16  }
  0xbc   :  { %92 = vsyncadd [#allocation4], 4294967280 }
  0xbd   :  { %61 = vsyncpa [#allocation4], 1 }

// kernel: linear_model_forward.2
= control target key start
LH: loop header
LB: loop body
LE: loop exit
PB: predicated region body
PF: predicated region fallthrough
CT: control target
= control target key end

     0   :  { %vm43_vm0 = vcmask 261120   ;;  %vm41_vm1 = vcmask 253952   ;;  %v237_v7 = vmov 0.0   ;;  %vm97_vm2 = vcmask 64512   ;;  %s310_s0 = inlined_call_operand.vmem [shape: f32[8,32], index: 0, kind: input, shape index: {}]   ;;  %s311_s1 = inlined_call_operand.vmem [shape: f32[1,1,32], index: 1, kind: output, shape index: {0}]   ;;  %s312_s2 = inlined_call_operand.vmem [shape: f32[1,32,32], index: 2, kind: output, shape index: {1}]  }
   0x1   :  { %v48_v0 = vld [vmem:[%s310_s0] sm:$0xff]  ;;  %42 = vst.msk [vmem:[%s311_s1] sm:$0x1] %vm41_vm1, %v237_v7 }
   0x2   :  { %65 = vxpose.xlu0.b32.start.end [1/1] (short) (narrow) %v48_v0, 32  ;;  %v51_v1 = vsel %vm43_vm0, %v48_v0, 0.0  ;;  %226 = vmatprep.subr.mxu0 %v48_v0  ;;  %45 = vst.msk [vmem:[%s312_s2 + $0x8] sm:$0xff] %vm43_vm0, %v237_v7  ;;  %44 = vst.msk [vmem:[%s312_s2] sm:$0xff] %vm43_vm0, %v237_v7 }
   0x3   :  { %v52_v2 = vrot.slane %v51_v1, 4  ;;  %227 = vmatpush3.msra.mxu0 %v48_v0  ;;  %234 = vmatprep.subr.mxu1 %v48_v0  ;;  %46 = vst.msk [vmem:[%s312_s2 + $0x10] sm:$0xff] %vm43_vm0, %v237_v7  ;;  %47 = vst.msk [vmem:[%s312_s2 + $0x18] sm:$0xff] %vm43_vm0, %v237_v7 }
   0x4   :  { %235 = vmatpush3.msra.mxu1 %v48_v0 }
   0x5   :  { %v53_v3 = vadd.f32 %v52_v2, %v51_v1 }
   0x7   :  { %v54_v4 = vrot.slane %v53_v3, 2 }
   0x8   :  { %v49_v9 = vld [vmem:[%s311_s1] sm:$0x1] }
   0x9   :  { %v55_v5 = vadd.f32 %v54_v4, %v53_v3  ;;  %v62_v15 = vld [vmem:[%s312_s2 + $0x8] sm:$0xff]  ;;  %v61_v16 = vld [vmem:[%s312_s2] sm:$0xff] }
   0xa   :  { %v64_v21 = vld [vmem:[%s312_s2 + $0x18] sm:$0xff]  ;;  %v63_v22 = vld [vmem:[%s312_s2 + $0x10] sm:$0xff] }
   0xb   :  { %v56_v6 = vrot.slane %v55_v5, 1 }
   0xd   :  { %v57_v8 = vadd.f32 %v56_v6, %v55_v5 }
   0xf   :  { %v58_v10 = vadd.f32 %v57_v8, %v49_v9 }
  0x11   :  { %60 = vst.msk [vmem:[%s311_s1] sm:$0x1] %vm41_vm1, %v58_v10 }
  0x82   :  { %v81_v11 = vpop.trf.xlu0 }
  0x83   :  { %228 = vmatprep.mubr.msk.f32.mxu0 %vm97_vm2, %v81_v11 }
  0x86   :  { %v82_v12 = vpop.trf.xlu0 }
  0x87   :  { %229 = vmatmul.mubr.msk.f32.vlgmr.msra.gmra.mrb[0].mxu0 %vm97_vm2, %v82_v12 }
  0x8a   :  { %v83_v13 = vpop.trf.xlu0 }
  0x8b   :  { %231 = vmatprep.mubr.msk.f32.mxu1 %vm97_vm2, %v83_v13 }
  0x8e   :  { %v84_v14 = vpop.trf.xlu0 }
  0x8f   :  { %232 = vmatmul.mubr.msk.f32.vlgmr.msra.gmra.mrb[0].mxu1 %vm97_vm2, %v84_v14 }
 0x15a   :  { %v230_v17 = vpop.f32.mrb[0].mxu0 }
 0x15b   :  { %v196_v18 = vadd.f32 %v230_v17, %v62_v15  ;;  %v176_v19 = vpop.f32.mrb[1].mxu0 }
 0x15c   :  { %v195_v20 = vadd.f32 %v176_v19, %v61_v16 }
 0x15d   :  { %200 = vst.msk [vmem:[%s312_s2 + $0x8] sm:$0xff] %vm43_vm0, %v196_v18 }
 0x15e   :  { %199 = vst.msk [vmem:[%s312_s2] sm:$0xff] %vm43_vm0, %v195_v20 }
 0x162   :  { %v233_v23 = vpop.f32.mrb[0].mxu1 }
 0x163   :  { %v198_v24 = vadd.f32 %v233_v23, %v64_v21  ;;  %v186_v25 = vpop.f32.mrb[1].mxu1 }
 0x164   :  { %v197_v26 = vadd.f32 %v186_v25, %v63_v22 }
 0x165   :  { %202 = vst.msk [vmem:[%s312_s2 + $0x18] sm:$0xff] %vm43_vm0, %v198_v24 }
 0x166   :  { %201 = vst.msk [vmem:[%s312_s2 + $0x10] sm:$0xff] %vm43_vm0, %v197_v26 }

</bundles_post_ra>
